<compile_context>
chip_gen: v6e
topology: v6e:2x2x1
jax: 0.10.0
libtpu: 0.0.40
codegen_flags: <defaults>
</compile_context>

<pallas_src>
import functools

import jax
import jax.numpy as jnp
from jax.experimental import pallas as pl
from jax.experimental.pallas import tpu as pltpu

EPS = 1e-5              # nn.BatchNorm2d default eps
LANE = 128              # pad K / C_out to multiples of this (lane width)
SUB = 16                # sublane granularity safe for bf16 blocks
MAX_TILE_M = 512        # max rows of the im2col matrix per pass-1 grid step
MAX_TILE_M_P2 = 2048    # pass 2 is purely HBM-bound: use bigger row tiles


def _round_up(n, m):
    return (n + m - 1) // m * m


def _tpu_vmem_bytes():
    try:
        info = pltpu.get_tpu_info()
        for attr in ("vmem_capacity_bytes", "vmem_bytes", "vmem_size_bytes"):
            v = getattr(info, attr, None)
            if v:
                return int(v)
    except Exception:
        pass
    return 64 * 1024 * 1024   # conservative default (v7x per-core VMEM)


VMEM_CAP = _tpu_vmem_bytes()
# Explicit scoped-VMEM limit: above the 16/32 MiB defaults, below physical capacity.
VMEM_LIMIT = int(min(VMEM_CAP * 3 // 4, 96 * 1024 * 1024))


def _choose_tile_m(m, k_pad, c_pad):
    """Pass-1 row tile: aim for >= 2 tiles (megacore), shrink if VMEM-bound."""
    tile = max(SUB, min(MAX_TILE_M, _round_up((m + 1) // 2, SUB)))
    budget = int(0.6 * VMEM_LIMIT)

    def working_set(t):   # double-buffered patch + y tiles + (double-buffered) weights
        return 2 * t * k_pad * 2 + 2 * t * c_pad * 2 + 2 * k_pad * c_pad * 2

    while tile > SUB and working_set(tile) > budget:
        tile = max(SUB, _round_up(tile // 2, SUB))
    return tile


def _choose_pass2_tile(m_pad, c_pad, n_row_streams):
    """Pass 2 is HBM-bound; pick the largest row tile that divides m_pad."""
    budget = int(0.5 * VMEM_LIMIT)
    per_row = 2 * n_row_streams * 4 * c_pad            # double-buffered, f32 worst case
    cap = min(m_pad, MAX_TILE_M_P2, max(SUB, (budget // per_row) // SUB * SUB))
    for cand in range(cap, SUB - 1, -SUB):
        if m_pad % cand == 0:
            return cand
    return m_pad


# --------------------- Pass 1: tiled matmul + BN statistics ------------------ #

def _matmul_stats_kernel(p_ref, w_ref, y_ref, s1_ref, s2_ref):
    """y = P @ W (bf16 x bf16 -> f32 acc); accumulate per-channel sum / sum(y^2)."""
    @pl.when(pl.program_id(1) == 0)
    def _init():
        s1_ref[...] = jnp.zeros_like(s1_ref)
        s2_ref[...] = jnp.zeros_like(s2_ref)

    y = jnp.dot(p_ref[...], w_ref[...], preferred_element_type=jnp.float32)
    y_ref[...] = y.astype(y_ref.dtype)                 # bf16 writeback (halves y traffic)
    # Stats use the exact f32 accumulator result; the (1, C) row broadcasts over
    # the 8 sublanes of the resident stat block (all 8 rows hold the same sums).
    s1_ref[...] += jnp.sum(y, axis=0, keepdims=True)
    s2_ref[...] += jnp.sum(y * y, axis=0, keepdims=True)


def conv_matmul_stats(patches, w_kc):
    """patches (M, K) bf16, w_kc (K, C) f32 ->
       y (M_pad, C_pad) bf16, sum/sumsq (NC*8, C_pad) f32 (per-shard partials)."""
    m, k = patches.shape
    _, c = w_kc.shape
    k_pad = _round_up(k, LANE)
    c_pad = _round_up(c, LANE)
    tile_m = _choose_tile_m(m, k_pad, c_pad)
    m_pad = _round_up(m, tile_m)
    m_tiles = m_pad // tile_m
    nc = 2 if m_tiles % 2 == 0 else 1     # leading "parallel" shards (v7x megacore)
    mpc = m_tiles // nc

    # Zero padding keeps the matmul and the BN sums exact (zero rows/cols add 0).
    p = jnp.pad(patches, ((0, m_pad - m), (0, k_pad - k))).astype(jnp.bfloat16)
    w = jnp.pad(w_kc, ((0, k_pad - k), (0, c_pad - c))).astype(jnp.bfloat16)

    flops = 2 * m_pad * k_pad * c_pad
    bytes_accessed = (m_pad * k_pad + k_pad * c_pad + m_pad * c_pad) * 2 + 2 * nc * 8 * c_pad * 4

    # TODO(synk): fuse im2col into this kernel (halo BlockSpecs / manual DMA over the
    # NHWC input) to remove the KH*KW-inflated patch matrix from HBM entirely.
    # TODO(synk): single-buffer the resident weight block (pipeline_mode=pl.Buffered(1))
    # once that is plumbed through this pallas_call pipeline path.
    y, s1, s2 = pl.pallas_call(
        _matmul_stats_kernel,
        grid=(nc, mpc),
        in_specs=[
            pl.BlockSpec((tile_m, k_pad), lambda cc, i, mpc=mpc: (cc * mpc + i, 0)),
            pl.BlockSpec((k_pad, c_pad), lambda cc, i: (0, 0)),   # weights: VMEM-resident
        ],
        out_specs=[
            pl.BlockSpec((tile_m, c_pad), lambda cc, i, mpc=mpc: (cc * mpc + i, 0)),
            pl.BlockSpec((8, c_pad), lambda cc, i: (cc, 0)),      # per-shard partial sum
            pl.BlockSpec((8, c_pad), lambda cc, i: (cc, 0)),      # per-shard partial sumsq
        ],
        out_shape=[
            jax.ShapeDtypeStruct((m_pad, c_pad), jnp.bfloat16),
            jax.ShapeDtypeStruct((nc * 8, c_pad), jnp.float32),
            jax.ShapeDtypeStruct((nc * 8, c_pad), jnp.float32),
        ],
        compiler_params=pltpu.CompilerParams(
            dimension_semantics=("parallel", "arbitrary"),
            vmem_limit_bytes=VMEM_LIMIT),
        cost_estimate=pl.CostEstimate(flops=flops, transcendentals=0,
                                      bytes_accessed=bytes_accessed),
    )(p, w)
    return y, s1, s2


# ------------- BatchNorm batch statistics -> per-channel affine (wrapper) ---- #

def _bn_scale_shift(s1, s2, gamma, beta, m_true, c_pad):
    """Per-channel (scale, shift) rows from batch sums (training-mode, biased var)."""
    s1 = s1.reshape(-1, 8, c_pad)[:, 0, :].sum(axis=0)    # reduce megacore shards
    s2 = s2.reshape(-1, 8, c_pad)[:, 0, :].sum(axis=0)
    mean = s1 / m_true
    var = s2 / m_true - mean * mean
    # TODO(synk): E[y^2]-E[y]^2 can cancel for large-mean activations; switch to a
    # shifted / two-pass variance if used beyond small-scale validation.
    g = jnp.pad(gamma.astype(jnp.float32), (0, c_pad - gamma.shape[0]))
    b = jnp.pad(beta.astype(jnp.float32), (0, c_pad - beta.shape[0]))
    scale = jax.lax.rsqrt(var + EPS) * g                  # padded lanes: g == 0 -> scale == 0
    shift = b - mean * scale
    return scale[None, :], shift[None, :]                 # (1, C_pad) rows for pass 2


# --------------- Pass 2: scale/shift (+ residual) (+ ReLU), tiled over M ----- #

def _bn_act_kernel(y_ref, sc_ref, sh_ref, o_ref, *, relu):
    y = y_ref[...].astype(jnp.float32) * sc_ref[...] + sh_ref[...]
    if relu:
        y = jnp.maximum(y, 0.0)
    o_ref[...] = y.astype(o_ref.dtype)


def _bn_add_relu_kernel(y_ref, sc_ref, sh_ref, res_ref, o_ref):
    y = y_ref[...].astype(jnp.float32) * sc_ref[...] + sh_ref[...] + res_ref[...]
    o_ref[...] = jnp.maximum(y, 0.0)


def _bn_add_bn_relu_kernel(y_ref, sc_ref, sh_ref, ys_ref, scs_ref, shs_ref, o_ref):
    y = y_ref[...].astype(jnp.float32) * sc_ref[...] + sh_ref[...]
    s = ys_ref[...].astype(jnp.float32) * scs_ref[...] + shs_ref[...]
    o_ref[...] = jnp.maximum(y + s, 0.0)


def bn_act(y, scale, shift, *, relu, out_dtype=jnp.float32):
    m_pad, c_pad = y.shape
    tile = _choose_pass2_tile(m_pad, c_pad, 2)
    row = pl.BlockSpec((tile, c_pad), lambda i: (i, 0))
    pin = pl.BlockSpec((1, c_pad), lambda i: (0, 0))
    return pl.pallas_call(
        functools.partial(_bn_act_kernel, relu=relu),
        grid=(m_pad // tile,),
        in_specs=[row, pin, pin],
        out_specs=row,
        out_shape=jax.ShapeDtypeStruct((m_pad, c_pad), out_dtype),
        compiler_params=pltpu.CompilerParams(
            dimension_semantics=("parallel",), vmem_limit_bytes=VMEM_LIMIT),
    )(y, scale, shift)


def bn_add_relu(y, scale, shift, res):
    m_pad, c_pad = y.shape
    tile = _choose_pass2_tile(m_pad, c_pad, 3)
    row = pl.BlockSpec((tile, c_pad), lambda i: (i, 0))
    pin = pl.BlockSpec((1, c_pad), lambda i: (0, 0))
    return pl.pallas_call(
        _bn_add_relu_kernel,
        grid=(m_pad // tile,),
        in_specs=[row, pin, pin, row],
        out_specs=row,
        out_shape=jax.ShapeDtypeStruct((m_pad, c_pad), jnp.float32),
        compiler_params=pltpu.CompilerParams(
            dimension_semantics=("parallel",), vmem_limit_bytes=VMEM_LIMIT),
    )(y, scale, shift, res)


def bn_add_bn_relu(y, scale, shift, ys, scale_s, shift_s):
    m_pad, c_pad = y.shape
    if ys.shape[0] != m_pad:   # the shortcut conv may have tiled M differently
        ys = ys[:m_pad] if ys.shape[0] > m_pad else jnp.pad(
            ys, ((0, m_pad - ys.shape[0]), (0, 0)))
    tile = _choose_pass2_tile(m_pad, c_pad, 3)
    row = pl.BlockSpec((tile, c_pad), lambda i: (i, 0))
    pin = pl.BlockSpec((1, c_pad), lambda i: (0, 0))
    return pl.pallas_call(
        _bn_add_bn_relu_kernel,
        grid=(m_pad // tile,),
        in_specs=[row, pin, pin, row, pin, pin],
        out_specs=row,
        out_shape=jax.ShapeDtypeStruct((m_pad, c_pad), jnp.float32),
        compiler_params=pltpu.CompilerParams(
            dimension_semantics=("parallel",), vmem_limit_bytes=VMEM_LIMIT),
    )(y, scale, shift, ys, scale_s, shift_s)


# ----------------------------------- Glue ------------------------------------ #

def im2col(x_nhwc, kh, kw, stride, pad):
    """(N,H,W,C) -> (N*Ho*Wo, kh*kw*C); K index ordering is (i, j, c)."""
    n, h, w, c = x_nhwc.shape
    xp = jnp.pad(x_nhwc, ((0, 0), (pad, pad), (pad, pad), (0, 0)))
    ho = (h + 2 * pad - kh) // stride + 1
    wo = (w + 2 * pad - kw) // stride + 1
    cols = []
    for i in range(kh):
        for j in range(kw):
            cols.append(xp[:, i:i + stride * ho:stride, j:j + stride * wo:stride, :])
    patches = jnp.concatenate(cols, axis=-1)
    return patches.reshape(n * ho * wo, kh * kw * c), ho, wo


def torch_w_to_matmul(w_oihw):
    """PyTorch (O, I, KH, KW) -> (KH*KW*I, O), matching im2col (i, j, c) order."""
    return jnp.transpose(w_oihw, (2, 3, 1, 0)).reshape(-1, w_oihw.shape[0]).astype(jnp.float32)


def basic_block_forward(x_nchw, params, stride):
    n, cin, h, w = x_nchw.shape
    cout = params["w1"].shape[0]
    x = jnp.transpose(x_nchw, (0, 2, 3, 1)).astype(jnp.float32)   # NHWC f32 (residual add)
    x_bf16 = x.astype(jnp.bfloat16)                               # conv inputs in bf16

    # conv1 (3x3, stride, pad=1) -> bn1(batch stats) -> relu, emitted directly in bf16
    p1, ho, wo = im2col(x_bf16, 3, 3, stride, 1)
    m1 = p1.shape[0]
    y1, a1, q1 = conv_matmul_stats(p1, torch_w_to_matmul(params["w1"]))
    sc1, sh1 = _bn_scale_shift(a1, q1, params["g1"], params["b1"], m1, y1.shape[1])
    o1 = bn_act(y1, sc1, sh1, relu=True, out_dtype=jnp.bfloat16)
    o1_nhwc = o1[:m1, :cout].reshape(n, ho, wo, cout)

    # conv2 (3x3, stride 1, pad=1)
    p2, _, _ = im2col(o1_nhwc, 3, 3, 1, 1)
    m2 = p2.shape[0]
    y2, a2, q2 = conv_matmul_stats(p2, torch_w_to_matmul(params["w2"]))
    sc2, sh2 = _bn_scale_shift(a2, q2, params["g2"], params["b2"], m2, y2.shape[1])

    if (stride != 1) or (cin != cout):
        # 1x1 projection conv; its BatchNorm is folded into the final add+ReLU kernel.
        ps, _, _ = im2col(x_bf16, 1, 1, stride, 0)
        ys, as_, qs = conv_matmul_stats(ps, torch_w_to_matmul(params["ws"]))
        scs, shs = _bn_scale_shift(as_, qs, params["gs"], params["bs"], m2, ys.shape[1])
        out = bn_add_bn_relu(y2, sc2, sh2, ys, scs, shs)
    else:
        m_pad, c_pad = y2.shape
        res = x.reshape(n * h * w, cin)
        if res.shape != (m_pad, c_pad):   # only copy when not already lane/row aligned
            res = jnp.pad(res, ((0, m_pad - m2), (0, c_pad - cin)))
        out = bn_add_relu(y2, sc2, sh2, res)

    out_nhwc = out[:m2, :cout].reshape(n, ho, wo, cout)
    return jnp.transpose(out_nhwc, (0, 3, 1, 2))   # back to NCHW


# ----------------------------- Pure-JAX reference ---------------------------- #
# Mirrors the kernel's numerics: conv operands quantized to bf16 (MXU path),
# conv outputs stored in bf16, BN statistics in f32 with batch (biased) variance.

def _q_bf16(x):
    return x.astype(jnp.bfloat16).astype(jnp.float32)


def _ref_conv(x, w, stride, pad):
    return jax.lax.conv_general_dilated(
        _q_bf16(x), _q_bf16(w), (stride, stride), ((pad, pad), (pad, pad)),
        dimension_numbers=("NCHW", "OIHW", "NCHW"))


def _ref_bn(y, g, b):
    # Batch stats from the f32 conv result; normalization applied to the bf16-
    # stored copy, mirroring the kernel's bf16 y writeback.
    mean = jnp.mean(y, axis=(0, 2, 3), keepdims=True)
    var = jnp.var(y, axis=(0, 2, 3), keepdims=True)   # biased, training-mode BN
    return ((_q_bf16(y) - mean) * jax.lax.rsqrt(var + EPS) * g[None, :, None, None]
            + b[None, :, None, None])


def basic_block_reference(x, params, stride):
    cin, cout = x.shape[1], params["w1"].shape[0]
    x = x.astype(jnp.float32)
    out = jax.nn.relu(_ref_bn(_ref_conv(x, params["w1"], stride, 1), params["g1"], params["b1"]))
    out = _ref_bn(_ref_conv(out, params["w2"], 1, 1), params["g2"], params["b2"])
    if stride != 1 or cin != cout:
        sc = _ref_bn(_ref_conv(x, params["ws"], stride, 0), params["gs"], params["bs"])
    else:
        sc = x
    return jax.nn.relu(out + sc)


# ------------------------------------ Main ----------------------------------- #

def _make_params(key, c_in, c_out, with_proj):
    ks = jax.random.split(key, 10)
    params = {
        "w1": 0.1 * jax.random.normal(ks[0], (c_out, c_in, 3, 3), jnp.float32),
        "g1": 1.0 + 0.1 * jax.random.normal(ks[1], (c_out,), jnp.float32),
        "b1": 0.1 * jax.random.normal(ks[2], (c_out,), jnp.float32),
        "w2": 0.1 * jax.random.normal(ks[3], (c_out, c_out, 3, 3), jnp.float32),
        "g2": 1.0 + 0.1 * jax.random.normal(ks[4], (c_out,), jnp.float32),
        "b2": 0.1 * jax.random.normal(ks[5], (c_out,), jnp.float32),
    }
    if with_proj:
        params.update({
            "ws": 0.1 * jax.random.normal(ks[6], (c_out, c_in, 1, 1), jnp.float32),
            "gs": 1.0 + 0.1 * jax.random.normal(ks[7], (c_out,), jnp.float32),
            "bs": 0.1 * jax.random.normal(ks[8], (c_out,), jnp.float32),
        })
    return params, ks[9]


def _run_case(key, n, c_in, h, w, c_out, stride):
    with_proj = (stride != 1) or (c_in != c_out)
    params, xkey = _make_params(key, c_in, c_out, with_proj)
    x = jax.random.normal(xkey, (n, c_in, h, w), jnp.float32)

    fwd = jax.jit(functools.partial(basic_block_forward, stride=stride))
    out = jax.block_until_ready(fwd(x, params))
    ref = jax.block_until_ready(basic_block_reference(x, params, stride))

    assert out.shape == (n, c_out, h // stride, w // stride), out.shape
    err = float(jnp.max(jnp.abs(out - ref)))
    assert jnp.allclose(out, ref, rtol=1e-2, atol=1e-2), err
    return err


if __name__ == "__main__":
    key = jax.random.PRNGKey(0)
    k1, k2 = jax.random.split(key)
    # Projection-shortcut path (stride 2, channel change).
    _run_case(k1, n=2, c_in=4, h=16, w=16, c_out=8, stride=2)
    # Identity-shortcut path (stride 1, same channels).
    _run_case(k2, n=2, c_in=8, h=16, w=16, c_out=8, stride=1)
    print("KERNEL_OK")
</pallas_src>

<mosaic_0001>
module attributes {stable_mosaic.version = 11 : i64} {
  func.func @_matmul_stats_kernel(%arg0: i32, %arg1: i32, %arg2: memref<64x128xbf16, #tpu.memory_space<vmem>>, %arg3: memref<128x128xbf16, #tpu.memory_space<vmem>>, %arg4: memref<64x128xbf16, #tpu.memory_space<vmem>>, %arg5: memref<8x128xf32, #tpu.memory_space<vmem>>, %arg6: memref<8x128xf32, #tpu.memory_space<vmem>>) attributes {dimension_semantics = [#tpu.dimension_semantics<parallel>, #tpu.dimension_semantics<arbitrary>], iteration_bounds = array<i64: 2, 1>, scalar_prefetch = 0 : i64, scratch_operands = 0 : i64, tpu.core_type = #tpu.core_type<tc>, window_params = [{transform_indices = @transform_0, window_bounds = array<i64: 64, 128>}, {pipeline_mode = #tpu.pipeline_mode<synchronous>, transform_indices = @transform_1, window_bounds = array<i64: 128, 128>}, {transform_indices = @transform_2, window_bounds = array<i64: 64, 128>}, {transform_indices = @transform_3, window_bounds = array<i64: 8, 128>}, {transform_indices = @transform_4, window_bounds = array<i64: 8, 128>}]} {
    %c0_i32 = arith.constant 0 : i32
    %0 = arith.cmpi eq, %arg1, %c0_i32 : i32
    %1 = arith.extui %0 : i1 to i32
    %c0_i32_0 = arith.constant 0 : i32
    %2 = arith.cmpi ne, %1, %c0_i32_0 : i32
    scf.if %2 {
      %cst_16 = arith.constant 0.000000e+00 : f32
      %21 = vector.broadcast %cst_16 : f32 to vector<8x128xf32>
      %c0_17 = arith.constant 0 : index
      %c0_18 = arith.constant 0 : index
      %22 = vector.load %arg5[%c0_17, %c0_18] : memref<8x128xf32, #tpu.memory_space<vmem>>, vector<8x128xf32>
      tpu.vector_store %arg5[%c0_17, %c0_18], %21 {strides = array<i32>} : memref<8x128xf32, #tpu.memory_space<vmem>>, vector<8x128xf32>,
      %cst_19 = arith.constant 0.000000e+00 : f32
      %23 = vector.broadcast %cst_19 : f32 to vector<8x128xf32>
      %c0_20 = arith.constant 0 : index
      %c0_21 = arith.constant 0 : index
      %24 = vector.load %arg6[%c0_20, %c0_21] : memref<8x128xf32, #tpu.memory_space<vmem>>, vector<8x128xf32>
      tpu.vector_store %arg6[%c0_20, %c0_21], %23 {strides = array<i32>} : memref<8x128xf32, #tpu.memory_space<vmem>>, vector<8x128xf32>,
    } else {
    }
    %c0 = arith.constant 0 : index
    %c0_1 = arith.constant 0 : index
    %3 = vector.load %arg2[%c0, %c0_1] : memref<64x128xbf16, #tpu.memory_space<vmem>>, vector<64x128xbf16>
    %c0_2 = arith.constant 0 : index
    %c0_3 = arith.constant 0 : index
    %4 = vector.load %arg3[%c0_2, %c0_3] : memref<128x128xbf16, #tpu.memory_space<vmem>>, vector<128x128xbf16>
    %cst = arith.constant dense<0.000000e+00> : vector<64x128xf32>
    %5 = tpu.matmul %3, %4, %cst {dimension_numbers = #tpu.dot_dimension_numbers<[1], [0], [0], [1], [0, 0, 1, 1], [], []>} : vector<64x128xbf16>, vector<128x128xbf16>, vector<64x128xf32> -> vector<64x128xf32>
    %6 = arith.truncf %5 : vector<64x128xf32> to vector<64x128xbf16>
    %c0_4 = arith.constant 0 : index
    %c0_5 = arith.constant 0 : index
    %7 = vector.load %arg4[%c0_4, %c0_5] : memref<64x128xbf16, #tpu.memory_space<vmem>>, vector<64x128xbf16>
    tpu.vector_store %arg4[%c0_4, %c0_5], %6 {strides = array<i32>} : memref<64x128xbf16, #tpu.memory_space<vmem>>, vector<64x128xbf16>,
    %c0_6 = arith.constant 0 : index
    %c0_7 = arith.constant 0 : index
    %8 = vector.load %arg5[%c0_6, %c0_7] : memref<8x128xf32, #tpu.memory_space<vmem>>, vector<8x128xf32>
    %cst_8 = arith.constant dense<0.000000e+00> : vector<128xf32>
    %9 = vector.multi_reduction <add>, %5, %cst_8 [0] : vector<64x128xf32> to vector<128xf32>
    %10 = vector.shape_cast %9 : vector<128xf32> to vector<1x128xf32>
    %11 = vector.broadcast %10 : vector<1x128xf32> to vector<8x128xf32>
    %12 = arith.addf %8, %11 : vector<8x128xf32>
    %c0_9 = arith.constant 0 : index
    %c0_10 = arith.constant 0 : index
    %13 = vector.load %arg5[%c0_9, %c0_10] : memref<8x128xf32, #tpu.memory_space<vmem>>, vector<8x128xf32>
    tpu.vector_store %arg5[%c0_9, %c0_10], %12 {strides = array<i32>} : memref<8x128xf32, #tpu.memory_space<vmem>>, vector<8x128xf32>,
    %c0_11 = arith.constant 0 : index
    %c0_12 = arith.constant 0 : index
    %14 = vector.load %arg6[%c0_11, %c0_12] : memref<8x128xf32, #tpu.memory_space<vmem>>, vector<8x128xf32>
    %15 = arith.mulf %5, %5 : vector<64x128xf32>
    %cst_13 = arith.constant dense<0.000000e+00> : vector<128xf32>
    %16 = vector.multi_reduction <add>, %15, %cst_13 [0] : vector<64x128xf32> to vector<128xf32>
    %17 = vector.shape_cast %16 : vector<128xf32> to vector<1x128xf32>
    %18 = vector.broadcast %17 : vector<1x128xf32> to vector<8x128xf32>
    %19 = arith.addf %14, %18 : vector<8x128xf32>
    %c0_14 = arith.constant 0 : index
    %c0_15 = arith.constant 0 : index
    %20 = vector.load %arg6[%c0_14, %c0_15] : memref<8x128xf32, #tpu.memory_space<vmem>>, vector<8x128xf32>
    tpu.vector_store %arg6[%c0_14, %c0_15], %19 {strides = array<i32>} : memref<8x128xf32, #tpu.memory_space<vmem>>, vector<8x128xf32>,
    return
  }
  func.func @transform_0(%arg0: i32, %arg1: i32) -> (i32, i32) {
    %c1_i32 = arith.constant 1 : i32
    %0 = arith.muli %arg0, %c1_i32 : i32
    %1 = arith.addi %0, %arg1 : i32
    %c0_i32 = arith.constant 0 : i32
    %c0_i32_0 = arith.constant 0 : i32
    return %1, %c0_i32 : i32, i32
  }
  func.func @transform_1(%arg0: i32, %arg1: i32) -> (i32, i32) {
    %c0_i32 = arith.constant 0 : i32
    %c0_i32_0 = arith.constant 0 : i32
    %c0_i32_1 = arith.constant 0 : i32
    return %c0_i32, %c0_i32_0 : i32, i32
  }
  func.func @transform_2(%arg0: i32, %arg1: i32) -> (i32, i32) {
    %c1_i32 = arith.constant 1 : i32
    %0 = arith.muli %arg0, %c1_i32 : i32
    %1 = arith.addi %0, %arg1 : i32
    %c0_i32 = arith.constant 0 : i32
    %c0_i32_0 = arith.constant 0 : i32
    return %1, %c0_i32 : i32, i32
  }
  func.func @transform_3(%arg0: i32, %arg1: i32) -> (i32, i32) {
    %c0_i32 = arith.constant 0 : i32
    %c0_i32_0 = arith.constant 0 : i32
    return %arg0, %c0_i32 : i32, i32
  }
  func.func @transform_4(%arg0: i32, %arg1: i32) -> (i32, i32) {
    %c0_i32 = arith.constant 0 : i32
    %c0_i32_0 = arith.constant 0 : i32
    return %arg0, %c0_i32 : i32, i32
  }
}

module attributes {stable_mosaic.version = 11 : i64} {
  func.func @_bn_act_kernel(%arg0: i32, %arg1: memref<128x128xbf16, #tpu.memory_space<vmem>>, %arg2: memref<1x128xf32, #tpu.memory_space<vmem>>, %arg3: memref<1x128xf32, #tpu.memory_space<vmem>>, %arg4: memref<128x128xbf16, #tpu.memory_space<vmem>>) attributes {dimension_semantics = [#tpu.dimension_semantics<parallel>], iteration_bounds = array<i64: 1>, scalar_prefetch = 0 : i64, scratch_operands = 0 : i64, tpu.core_type = #tpu.core_type<tc>, window_params = [{transform_indices = @transform_0, window_bounds = array<i64: 128, 128>}, {pipeline_mode = #tpu.pipeline_mode<synchronous>, transform_indices = @transform_1, window_bounds = array<i64: 1, 128>}, {pipeline_mode = #tpu.pipeline_mode<synchronous>, transform_indices = @transform_2, window_bounds = array<i64: 1, 128>}, {transform_indices = @transform_3, window_bounds = array<i64: 128, 128>}]} {
    %c0 = arith.constant 0 : index
    %c0_0 = arith.constant 0 : index
    %0 = vector.load %arg1[%c0, %c0_0] : memref<128x128xbf16, #tpu.memory_space<vmem>>, vector<128x128xbf16>
    %1 = arith.extf %0 : vector<128x128xbf16> to vector<128x128xf32>
    %c0_1 = arith.constant 0 : index
    %c0_2 = arith.constant 0 : index
    %2 = vector.load %arg2[%c0_1, %c0_2] : memref<1x128xf32, #tpu.memory_space<vmem>>, vector<1x128xf32>
    %3 = vector.broadcast %2 : vector<1x128xf32> to vector<128x128xf32>
    %4 = arith.mulf %1, %3 : vector<128x128xf32>
    %c0_3 = arith.constant 0 : index
    %c0_4 = arith.constant 0 : index
    %5 = vector.load %arg3[%c0_3, %c0_4] : memref<1x128xf32, #tpu.memory_space<vmem>>, vector<1x128xf32>
    %6 = vector.broadcast %5 : vector<1x128xf32> to vector<128x128xf32>
    %7 = arith.addf %4, %6 : vector<128x128xf32>
    %cst = arith.constant 0.000000e+00 : f32
    %8 = vector.broadcast %cst : f32 to vector<128x128xf32>
    %9 = arith.maximumf %7, %8 : vector<128x128xf32>
    %10 = arith.truncf %9 : vector<128x128xf32> to vector<128x128xbf16>
    %c0_5 = arith.constant 0 : index
    %c0_6 = arith.constant 0 : index
    %11 = vector.load %arg4[%c0_5, %c0_6] : memref<128x128xbf16, #tpu.memory_space<vmem>>, vector<128x128xbf16>
    tpu.vector_store %arg4[%c0_5, %c0_6], %10 {strides = array<i32>} : memref<128x128xbf16, #tpu.memory_space<vmem>>, vector<128x128xbf16>,
    return
  }
  func.func @transform_0(%arg0: i32) -> (i32, i32) {
    %c0_i32 = arith.constant 0 : i32
    %c0_i32_0 = arith.constant 0 : i32
    return %arg0, %c0_i32 : i32, i32
  }
  func.func @transform_1(%arg0: i32) -> (i32, i32) {
    %c0_i32 = arith.constant 0 : i32
    %c0_i32_0 = arith.constant 0 : i32
    %c0_i32_1 = arith.constant 0 : i32
    return %c0_i32, %c0_i32_0 : i32, i32
  }
  func.func @transform_2(%arg0: i32) -> (i32, i32) {
    %c0_i32 = arith.constant 0 : i32
    %c0_i32_0 = arith.constant 0 : i32
    %c0_i32_1 = arith.constant 0 : i32
    return %c0_i32, %c0_i32_0 : i32, i32
  }
  func.func @transform_3(%arg0: i32) -> (i32, i32) {
    %c0_i32 = arith.constant 0 : i32
    %c0_i32_0 = arith.constant 0 : i32
    return %arg0, %c0_i32 : i32, i32
  }
}

module attributes {stable_mosaic.version = 11 : i64} {
  func.func @_bn_add_bn_relu_kernel(%arg0: i32, %arg1: memref<128x128xbf16, #tpu.memory_space<vmem>>, %arg2: memref<1x128xf32, #tpu.memory_space<vmem>>, %arg3: memref<1x128xf32, #tpu.memory_space<vmem>>, %arg4: memref<128x128xbf16, #tpu.memory_space<vmem>>, %arg5: memref<1x128xf32, #tpu.memory_space<vmem>>, %arg6: memref<1x128xf32, #tpu.memory_space<vmem>>, %arg7: memref<128x128xf32, #tpu.memory_space<vmem>>) attributes {dimension_semantics = [#tpu.dimension_semantics<parallel>], iteration_bounds = array<i64: 1>, scalar_prefetch = 0 : i64, scratch_operands = 0 : i64, tpu.core_type = #tpu.core_type<tc>, window_params = [{transform_indices = @transform_0, window_bounds = array<i64: 128, 128>}, {pipeline_mode = #tpu.pipeline_mode<synchronous>, transform_indices = @transform_1, window_bounds = array<i64: 1, 128>}, {pipeline_mode = #tpu.pipeline_mode<synchronous>, transform_indices = @transform_2, window_bounds = array<i64: 1, 128>}, {transform_indices = @transform_3, window_bounds = array<i64: 128, 128>}, {pipeline_mode = #tpu.pipeline_mode<synchronous>, transform_indices = @transform_4, window_bounds = array<i64: 1, 128>}, {pipeline_mode = #tpu.pipeline_mode<synchronous>, transform_indices = @transform_5, window_bounds = array<i64: 1, 128>}, {transform_indices = @transform_6, window_bounds = array<i64: 128, 128>}]} {
    %c0 = arith.constant 0 : index
    %c0_0 = arith.constant 0 : index
    %0 = vector.load %arg1[%c0, %c0_0] : memref<128x128xbf16, #tpu.memory_space<vmem>>, vector<128x128xbf16>
    %1 = arith.extf %0 : vector<128x128xbf16> to vector<128x128xf32>
    %c0_1 = arith.constant 0 : index
    %c0_2 = arith.constant 0 : index
    %2 = vector.load %arg2[%c0_1, %c0_2] : memref<1x128xf32, #tpu.memory_space<vmem>>, vector<1x128xf32>
    %3 = vector.broadcast %2 : vector<1x128xf32> to vector<128x128xf32>
    %4 = arith.mulf %1, %3 : vector<128x128xf32>
    %c0_3 = arith.constant 0 : index
    %c0_4 = arith.constant 0 : index
    %5 = vector.load %arg3[%c0_3, %c0_4] : memref<1x128xf32, #tpu.memory_space<vmem>>, vector<1x128xf32>
    %6 = vector.broadcast %5 : vector<1x128xf32> to vector<128x128xf32>
    %7 = arith.addf %4, %6 : vector<128x128xf32>
    %c0_5 = arith.constant 0 : index
    %c0_6 = arith.constant 0 : index
    %8 = vector.load %arg4[%c0_5, %c0_6] : memref<128x128xbf16, #tpu.memory_space<vmem>>, vector<128x128xbf16>
    %9 = arith.extf %8 : vector<128x128xbf16> to vector<128x128xf32>
    %c0_7 = arith.constant 0 : index
    %c0_8 = arith.constant 0 : index
    %10 = vector.load %arg5[%c0_7, %c0_8] : memref<1x128xf32, #tpu.memory_space<vmem>>, vector<1x128xf32>
    %11 = vector.broadcast %10 : vector<1x128xf32> to vector<128x128xf32>
    %12 = arith.mulf %9, %11 : vector<128x128xf32>
    %c0_9 = arith.constant 0 : index
    %c0_10 = arith.constant 0 : index
    %13 = vector.load %arg6[%c0_9, %c0_10] : memref<1x128xf32, #tpu.memory_space<vmem>>, vector<1x128xf32>
    %14 = vector.broadcast %13 : vector<1x128xf32> to vector<128x128xf32>
    %15 = arith.addf %12, %14 : vector<128x128xf32>
    %16 = arith.addf %7, %15 : vector<128x128xf32>
    %cst = arith.constant 0.000000e+00 : f32
    %17 = vector.broadcast %cst : f32 to vector<128x128xf32>
    %18 = arith.maximumf %16, %17 : vector<128x128xf32>
    %c0_11 = arith.constant 0 : index
    %c0_12 = arith.constant 0 : index
    %19 = vector.load %arg7[%c0_11, %c0_12] : memref<128x128xf32, #tpu.memory_space<vmem>>, vector<128x128xf32>
    tpu.vector_store %arg7[%c0_11, %c0_12], %18 {strides = array<i32>} : memref<128x128xf32, #tpu.memory_space<vmem>>, vector<128x128xf32>,
    return
  }
  func.func @transform_0(%arg0: i32) -> (i32, i32) {
    %c0_i32 = arith.constant 0 : i32
    %c0_i32_0 = arith.constant 0 : i32
    return %arg0, %c0_i32 : i32, i32
  }
  func.func @transform_1(%arg0: i32) -> (i32, i32) {
    %c0_i32 = arith.constant 0 : i32
    %c0_i32_0 = arith.constant 0 : i32
    %c0_i32_1 = arith.constant 0 : i32
    return %c0_i32, %c0_i32_0 : i32, i32
  }
  func.func @transform_2(%arg0: i32) -> (i32, i32) {
    %c0_i32 = arith.constant 0 : i32
    %c0_i32_0 = arith.constant 0 : i32
    %c0_i32_1 = arith.constant 0 : i32
    return %c0_i32, %c0_i32_0 : i32, i32
  }
  func.func @transform_3(%arg0: i32) -> (i32, i32) {
    %c0_i32 = arith.constant 0 : i32
    %c0_i32_0 = arith.constant 0 : i32
    return %arg0, %c0_i32 : i32, i32
  }
  func.func @transform_4(%arg0: i32) -> (i32, i32) {
    %c0_i32 = arith.constant 0 : i32
    %c0_i32_0 = arith.constant 0 : i32
    %c0_i32_1 = arith.constant 0 : i32
    return %c0_i32, %c0_i32_0 : i32, i32
  }
  func.func @transform_5(%arg0: i32) -> (i32, i32) {
    %c0_i32 = arith.constant 0 : i32
    %c0_i32_0 = arith.constant 0 : i32
    %c0_i32_1 = arith.constant 0 : i32
    return %c0_i32, %c0_i32_0 : i32, i32
  }
  func.func @transform_6(%arg0: i32) -> (i32, i32) {
    %c0_i32 = arith.constant 0 : i32
    %c0_i32_0 = arith.constant 0 : i32
    return %arg0, %c0_i32 : i32, i32
  }
}

</mosaic_0001>

<bundles_post_ra>
// kernel: basic_block_forward.6
= control target key start
LH: loop header
LB: loop body
LE: loop exit
PB: predicated region body
PF: predicated region fallthrough
CT: control target
= control target key end

     0   :  { %s422_s0 = inlined_call_operand.vmem [shape: bf16[128,128], index: 0, kind: input, shape index: {}]   ;;  %s423_s1 = inlined_call_operand.vmem [shape: f32[1,128], index: 1, kind: input, shape index: {}]   ;;  %s424_s2 = inlined_call_operand.vmem [shape: f32[1,128], index: 2, kind: input, shape index: {}]   ;;  %s425_s3 = inlined_call_operand.vmem [shape: bf16[128,128], index: 3, kind: output, shape index: {}]  }
   0x1   :  { %v227_v0 = vld [vmem:[%s422_s0] sm:$0xff]   ;;  %v298_v4 = vld [vmem:[%s422_s0 + $0x8] sm:$0xff]   ;;  %v299_v5 = vld [vmem:[%s422_s0 + $0x10] sm:$0xff]  }
   0x2   :  { %v338_v1 = vld [vmem:[%s423_s1] ss:$0 sm:$0xff]  ;;  %v228_v2 = vunpack.c.l.bf16 %v227_v0  ;;  %v229_v3 = vunpack.c.h.bf16 %v227_v0  ;;  %v300_v6 = vld [vmem:[%s422_s0 + $0x18] sm:$0xff]   ;;  %v232_v8 = vunpack.c.l.bf16 %v298_v4  ;;  %v233_v9 = vunpack.c.h.bf16 %v298_v4  ;;  %v302_v33 = vld [vmem:[%s422_s0 + $0x28] sm:$0xff]  }
   0x3   :  { %v352_v7 = vld [vmem:[%s424_s2] ss:$0 sm:$0xff]  ;;  %v236_v10 = vunpack.c.l.bf16 %v299_v5  ;;  %v237_v11 = vunpack.c.h.bf16 %v299_v5  ;;  %v240_v14 = vunpack.c.l.bf16 %v300_v6  ;;  %v241_v15 = vunpack.c.h.bf16 %v300_v6  ;;  %v303_v38 = vld [vmem:[%s422_s0 + $0x30] sm:$0xff]   ;;  %v304_v43 = vld [vmem:[%s422_s0 + $0x38] sm:$0xff]  }
   0x4   :  { %v53_v12 = vmul.f32 %v228_v2, %v338_v1  ;;  %v54_v13 = vmul.f32 %v229_v3, %v338_v1  ;;  %v55_v16 = vmul.f32 %v232_v8, %v338_v1  ;;  %v56_v17 = vmul.f32 %v233_v9, %v338_v1  ;;  %v301_v28 = vld [vmem:[%s422_s0 + $0x20] sm:$0xff]  }
   0x5   :  { %v57_v18 = vmul.f32 %v236_v10, %v338_v1  ;;  %v58_v19 = vmul.f32 %v237_v11, %v338_v1  ;;  %v59_v22 = vmul.f32 %v240_v14, %v338_v1  ;;  %v60_v23 = vmul.f32 %v241_v15, %v338_v1 }
   0x6   :  { %v76_v20 = vadd.f32 %v352_v7, %v53_v12  ;;  %v77_v21 = vadd.f32 %v352_v7, %v54_v13  ;;  %v78_v24 = vadd.f32 %v352_v7, %v55_v16  ;;  %v79_v25 = vadd.f32 %v352_v7, %v56_v17 }
   0x7   :  { %v80_v26 = vadd.f32 %v352_v7, %v57_v18  ;;  %v81_v27 = vadd.f32 %v352_v7, %v58_v19  ;;  %v82_v31 = vadd.f32 %v352_v7, %v59_v22  ;;  %v83_v32 = vadd.f32 %v352_v7, %v60_v23 }
   0x8   :  { %v92_v29 = vmax.f32 %v76_v20, 0.0  ;;  %v93_v30 = vmax.f32 %v77_v21, 0.0  ;;  %v94_v34 = vmax.f32 %v78_v24, 0.0  ;;  %v95_v35 = vmax.f32 %v79_v25, 0.0 }
   0x9   :  { %v96_v36 = vmax.f32 %v80_v26, 0.0  ;;  %v97_v37 = vmax.f32 %v81_v27, 0.0  ;;  %v98_v40 = vmax.f32 %v82_v31, 0.0  ;;  %v99_v41 = vmax.f32 %v83_v32, 0.0 }
   0xa   :  { %v261_v39 = vpack.c.bf16 %v93_v30, %v92_v29  ;;  %v244_v42 = vunpack.c.l.bf16 %v301_v28  ;;  %v266_v44 = vpack.c.bf16 %v95_v35, %v94_v34  ;;  %v245_v46 = vunpack.c.h.bf16 %v301_v28 }
   0xb   :  { %v271_v45 = vpack.c.bf16 %v97_v37, %v96_v36  ;;  %v248_v47 = vunpack.c.l.bf16 %v302_v33  ;;  %v276_v48 = vpack.c.bf16 %v99_v41, %v98_v40  ;;  %v249_v50 = vunpack.c.h.bf16 %v302_v33 }
   0xc   :  { %262 = vst [vmem:[%s425_s3] sm:$0xff] %v261_v39   ;;  %v61_v49 = vmul.f32 %v244_v42, %v338_v1  ;;  %v252_v51 = vunpack.c.l.bf16 %v303_v38  ;;  %305 = vst [vmem:[%s425_s3 + $0x8] sm:$0xff] %v266_v44   ;;  %v62_v52 = vmul.f32 %v245_v46, %v338_v1  ;;  %v253_v54 = vunpack.c.h.bf16 %v303_v38 }
   0xd   :  { %306 = vst [vmem:[%s425_s3 + $0x10] sm:$0xff] %v271_v45   ;;  %v63_v53 = vmul.f32 %v248_v47, %v338_v1  ;;  %v256_v55 = vunpack.c.l.bf16 %v304_v43  ;;  %307 = vst [vmem:[%s425_s3 + $0x18] sm:$0xff] %v276_v48   ;;  %v64_v57 = vmul.f32 %v249_v50, %v338_v1  ;;  %v257_v59 = vunpack.c.h.bf16 %v304_v43 }
   0xe   :  { %v84_v56 = vadd.f32 %v352_v7, %v61_v49  ;;  %v65_v58 = vmul.f32 %v252_v51, %v338_v1  ;;  %v85_v60 = vadd.f32 %v352_v7, %v62_v52  ;;  %v66_v62 = vmul.f32 %v253_v54, %v338_v1 }
   0xf   :  { %v86_v61 = vadd.f32 %v352_v7, %v63_v53  ;;  %v67_v63 = vmul.f32 %v256_v55, %v338_v1  ;;  %v87_v2 = vadd.f32 %v352_v7, %v64_v57  ;;  %v68_v4 = vmul.f32 %v257_v59, %v338_v1 }
  0x10   :  { %v100_v0 = vmax.f32 %v84_v56, 0.0  ;;  %v88_v3 = vadd.f32 %v352_v7, %v65_v58  ;;  %v101_v5 = vmax.f32 %v85_v60, 0.0  ;;  %v89_v8 = vadd.f32 %v352_v7, %v66_v62 }
  0x11   :  { %v102_v6 = vmax.f32 %v86_v61, 0.0  ;;  %v90_v9 = vadd.f32 %v352_v7, %v67_v63  ;;  %v103_v10 = vmax.f32 %v87_v2, 0.0  ;;  %v91_v12 = vadd.f32 %v352_v7, %v68_v4 }
  0x12   :  { %v104_v11 = vmax.f32 %v88_v3, 0.0  ;;  %v281_v13 = vpack.c.bf16 %v101_v5, %v100_v0  ;;  %v105_v14 = vmax.f32 %v89_v8, 0.0 }
  0x13   :  { %v106_v15 = vmax.f32 %v90_v9, 0.0  ;;  %v286_v16 = vpack.c.bf16 %v103_v10, %v102_v6  ;;  %v107_v17 = vmax.f32 %v91_v12, 0.0 }
  0x14   :  { %308 = vst [vmem:[%s425_s3 + $0x20] sm:$0xff] %v281_v13   ;;  %v291_v1 = vpack.c.bf16 %v105_v14, %v104_v11 }
  0x15   :  { %309 = vst [vmem:[%s425_s3 + $0x28] sm:$0xff] %v286_v16   ;;  %v296_v18 = vpack.c.bf16 %v107_v17, %v106_v15 }
  0x16   :  { %310 = vst [vmem:[%s425_s3 + $0x30] sm:$0xff] %v291_v1  }
  0x17   :  { %311 = vst [vmem:[%s425_s3 + $0x38] sm:$0xff] %v296_v18  }

// kernel: basic_block_forward.5
= control target key start
LH: loop header
LB: loop body
LE: loop exit
PB: predicated region body
PF: predicated region fallthrough
CT: control target
= control target key end

     0   :  { %s826_s15 = smov 0   ;;  %s828_s16 = smov 0   ;;  %s907_s0 = inlined_call_operand.vmem [shape: bf16[128,128], index: 0, kind: input, shape index: {}]   ;;  %s908_s1 = inlined_call_operand.vmem [shape: bf16[128,128], index: 1, kind: input, shape index: {}]   ;;  %s909_s2 = inlined_call_operand.vmem [shape: bf16[128,128], index: 2, kind: output, shape index: {0}]   ;;  %s910_s3 = inlined_call_operand.vmem [shape: f32[16,128], index: 3, kind: output, shape index: {1}]   ;;  %s911_s4 = inlined_call_operand.vmem [shape: f32[16,128], index: 4, kind: output, shape index: {2}]  }
   0x1   :  { %s830_s17 = smov 0  }
   0x2 LB: > { %s27_s18 = sadd.s32 1, %s795_s16  ;;  %p628_p0 = scmp.ge.s32.totalorder %s799_s17, 1  ;;  %s799_s17 = sphi %s830_s17, %s15_s17   ;;  %s795_s16 = sphi %s828_s16, %s913_s16   ;;  %s791_s15 = sphi %s826_s15, %s912_s15  }
   0x3   : > { %p29_p1 = scmp.ge.s32.totalorder %s27_s18, 2  ;;  %p186_p2 = scmp.lt.s32.totalorder %s799_s17, 3 }
   0x5   : > { %s915_s18 = smov (%p29_p1, %s27_s18), 0  ;;  %p187_p3 = pnand %p628_p0, %p186_p2 }
   0x6   : > { %s629_s21 = sshll.u32 (!%p187_p3), %s791_s15, 3  ;;  %p238_p5 = scmp.lt.s32.totalorder (!%p187_p3), %s791_s15, 1 }
   0x7   : > { %190 = sbr.rel (%p187_p3) target bundleno = 273 (0x111), region = 28  ;;  %p224_p4 = scmp.lt.s32.totalorder (!%p187_p3), %s629_s21, 15 }
   0xc   : > { %v765_v0 = vld [vmem:[%s908_s1 + $0x38] sm:$0xff]   ;;  %v766_v1 = vld [vmem:[%s908_s1 + $0x30] sm:$0xff]   ;;  %s917_s21 = smov (!%p224_p4, %s629_s21), 15  ;;  %v767_v2 = vld [vmem:[%s908_s1 + $0x28] sm:$0xff]   ;;  %s919_s15 = smov (!%p238_p5, %s791_s15), 1 }
   0xd   : > { %700 = vmatprep.subr.bf16.mxu0 %v765_v0  ;;  %724 = vmatprep.subr.bf16.mxu1 %v765_v0  ;;  %s630_s26 = sshll.u32 %s917_s21, 2  ;;  %v768_v3 = vld [vmem:[%s908_s1 + $0x20] sm:$0xff]   ;;  %v769_v6 = vld [vmem:[%s908_s1 + $0x18] sm:$0xff]   ;;  %v770_v7 = vld [vmem:[%s908_s1 + $0x10] sm:$0xff]   ;;  %s633_s21 = sshll.u32 %s919_s15, 3 }
   0xe   : > { %701 = vmatpush3.bf16.msra.mxu0 %v765_v0  ;;  %732 = vmatpush3.bf16.msra.mxu1 %v765_v0  ;;  %s864_s29 = scalar_lea.vmem %s907_s0, %s630_s26  ;;  %v771_v8 = vld [vmem:[%s908_s1 + $0x8] sm:$0xff]   ;;  %v772_v9 = vld [vmem:[%s908_s1] sm:$0xff]   ;;  %s235_s20 = scalar_lea.vmem %s909_s2, %s630_s26 }
   0xf   : > { %702 = vmatprep.subr.bf16.mxu0 %v766_v1  ;;  %725 = vmatprep.subr.bf16.mxu1 %v766_v1  ;;  %v773_v4 = vld [vmem:[%s864_s29] sm:$0xff]   ;;  %v775_v5 = vld [vmem:[%s864_s29 + $0x10] sm:$0xff]   ;;  %v774_v10 = vld [vmem:[%s864_s29 + $0x8] sm:$0xff]   ;;  %s241_s24 = scalar_lea.vmem %s910_s3, %s633_s21  ;;  %s245_s27 = scalar_lea.vmem %s911_s4, %s633_s21 }
  0x10   : > { %716 = vmatprep.mubr.bf16.mxu0 %v773_v4  ;;  %720 = vmatprep.mubr.bf16.mxu1 %v775_v5  ;;  %v776_v11 = vld [vmem:[%s864_s29 + $0x18] sm:$0xff]  }
  0x12   : > { %703 = vmatpush3.bf16.msra.mxu0 %v766_v1  ;;  %733 = vmatpush3.bf16.msra.mxu1 %v766_v1 }
  0x13   : > { %704 = vmatprep.subr.bf16.mxu0 %v767_v2  ;;  %726 = vmatprep.subr.bf16.mxu1 %v767_v2 }
  0x16   : > { %705 = vmatpush3.bf16.msra.mxu0 %v767_v2  ;;  %734 = vmatpush3.bf16.msra.mxu1 %v767_v2 }
  0x17   : > { %706 = vmatprep.subr.bf16.mxu0 %v768_v3  ;;  %727 = vmatprep.subr.bf16.mxu1 %v768_v3 }
  0x1a   : > { %707 = vmatpush3.bf16.msra.mxu0 %v768_v3  ;;  %735 = vmatpush3.bf16.msra.mxu1 %v768_v3 }
  0x1b   : > { %708 = vmatprep.subr.bf16.mxu0 %v769_v6  ;;  %728 = vmatprep.subr.bf16.mxu1 %v769_v6 }
  0x1e   : > { %709 = vmatpush3.bf16.msra.mxu0 %v769_v6  ;;  %736 = vmatpush3.bf16.msra.mxu1 %v769_v6 }
  0x1f   : > { %710 = vmatprep.subr.bf16.mxu0 %v770_v7  ;;  %729 = vmatprep.subr.bf16.mxu1 %v770_v7 }
  0x22   : > { %711 = vmatpush3.bf16.msra.mxu0 %v770_v7  ;;  %737 = vmatpush3.bf16.msra.mxu1 %v770_v7 }
  0x23   : > { %712 = vmatprep.subr.bf16.mxu0 %v771_v8  ;;  %730 = vmatprep.subr.bf16.mxu1 %v771_v8 }
  0x26   : > { %713 = vmatpush3.bf16.msra.mxu0 %v771_v8  ;;  %738 = vmatpush3.bf16.msra.mxu1 %v771_v8 }
  0x27   : > { %714 = vmatprep.subr.bf16.mxu0 %v772_v9  ;;  %731 = vmatprep.subr.bf16.mxu1 %v772_v9 }
  0x2a   : > { %715 = vmatpush3.bf16.msra.mxu0 %v772_v9  ;;  %739 = vmatpush3.bf16.msra.mxu1 %v772_v9 }
  0x2d   : > { %717 = vmatmul.mubr.bf16.vlgmr.msra.gmra.mxu0 %v774_v10  ;;  %721 = vmatmul.mubr.bf16.vlgmr.msra.gmra.mxu1 %v776_v11 }
  0xed   : > { %v718_v12 = vpop.f32.mrf.mxu0  ;;  %v722_v13 = vpop.f32.mrf.mxu1 }
  0xee   : > { %v473_v27 = vmul.f32 %v718_v12, %v718_v12  ;;  %v477_v39 = vmul.f32 %v722_v13, %v722_v13 }
  0xef   : > { %v383_v14 = vpop.f32.mrf.mxu0  ;;  %v399_v15 = vpop.f32.mrf.mxu1 }
  0xf0   : > { %v471_v20 = vmul.f32 %v383_v14, %v383_v14  ;;  %v475_v33 = vmul.f32 %v399_v15, %v399_v15 }
  0xf1   : > { %v719_v16 = vpop.f32.mrf.mxu0  ;;  %v723_v17 = vpop.f32.mrf.mxu1 }
  0xf2   : > { %v673_v18 = vpack.c.bf16 %v719_v16, %v718_v12  ;;  %v683_v19 = vpack.c.bf16 %v723_v17, %v722_v13  ;;  %v474_v30 = vmul.f32 %v719_v16, %v719_v16  ;;  %v478_v42 = vmul.f32 %v723_v17, %v723_v17 }
  0xf3   : > { %v386_v21 = vpop.f32.mrf.mxu0  ;;  %v402_v22 = vpop.f32.mrf.mxu1 }
  0xf4   : > { %685 = vst [vmem:[%s235_s20 + $0x8] sm:$0xff] %v673_v18   ;;  %v668_v23 = vpack.c.bf16 %v386_v21, %v383_v14  ;;  %v455_v24 = vadd.f32 %v386_v21, %v383_v14  ;;  %v472_v25 = vmul.f32 %v386_v21, %v386_v21  ;;  %687 = vst [vmem:[%s235_s20 + $0x18] sm:$0xff] %v683_v19  }
  0xf5   : > { %v678_v26 = vpack.c.bf16 %v402_v22, %v399_v15  ;;  %v476_v37 = vmul.f32 %v402_v22, %v402_v22 }
  0xf6   : > { %669 = vst [vmem:[%s235_s20] sm:$0xff] %v668_v23   ;;  %v456_v28 = vadd.f32 %v718_v12, %v455_v24  ;;  %v479_v29 = vadd.f32 %v472_v25, %v471_v20 }
  0xf7   : > { %686 = vst [vmem:[%s235_s20 + $0x10] sm:$0xff] %v678_v26  }
  0xf8   : > { %v480_v31 = vadd.f32 %v479_v29, %v473_v27  ;;  %v457_v32 = vadd.f32 %v719_v16, %v456_v28 }
  0xfa   : > { %v458_v34 = vadd.f32 %v457_v32, %v399_v15  ;;  %v481_v35 = vadd.f32 %v480_v31, %v474_v30 }
  0xfc   : > { %v459_v36 = vadd.f32 %v458_v34, %v402_v22  ;;  %v482_v38 = vadd.f32 %v481_v35, %v475_v33 }
  0xfe   : > { %v460_v40 = vadd.f32 %v722_v13, %v459_v36  ;;  %v483_v41 = vadd.f32 %v482_v38, %v476_v37 }
 0x100   : > { %v461_v43 = vadd.f32 %v723_v17, %v460_v40  ;;  %v484_v44 = vadd.f32 %v483_v41, %v477_v39 }
 0x102   : > { %v462_v45 = vrot.slane %v461_v43, 4  ;;  %v485_v46 = vadd.f32 %v484_v44, %v478_v42 }
 0x104   : > { %v463_v47 = vadd.f32 %v462_v45, %v461_v43  ;;  %v486_v48 = vrot.slane %v485_v46, 4 }
 0x106   : > { %v464_v49 = vrot.slane %v463_v47, 2  ;;  %v487_v50 = vadd.f32 %v486_v48, %v485_v46 }
 0x108   : > { %v465_v51 = vadd.f32 %v464_v49, %v463_v47  ;;  %v488_v52 = vrot.slane %v487_v50, 2 }
 0x10a   : > { %v466_v53 = vrot.slane %v465_v51, 1  ;;  %v489_v54 = vadd.f32 %v488_v52, %v487_v50 }
 0x10c   : > { %v467_v55 = vadd.f32 %v466_v53, %v465_v51  ;;  %v490_v56 = vrot.slane %v489_v54, 1 }
 0x10e   : > { %v491_v57 = vadd.f32 %v490_v56, %v489_v54  ;;  %469 = vst [vmem:[%s241_s24] sm:$0xff] %v467_v55 }
 0x110   : > { %493 = vst [vmem:[%s245_s27] sm:$0xff] %v491_v57 }
 0x111 PF: > { %s15_s17 = sadd.s32 1, %s799_s17   ;;  %s912_s15 = smov %s795_s16 }
 0x112   : > { %p12_p6 = scmp.ge.s32.totalorder %s15_s17, 4   ;;  %s913_s16 = smov %s915_s18 }
 0x114   :  { %14 = sbr.rel (!%p12_p6) target bundleno = 2 (0x2), region = 86 }

// kernel: basic_block_forward.9
= control target key start
LH: loop header
LB: loop body
LE: loop exit
PB: predicated region body
PF: predicated region fallthrough
CT: control target
= control target key end

     0   :  { %s528_s0 = inlined_call_operand.vmem [shape: bf16[128,128], index: 0, kind: input, shape index: {}]   ;;  %s529_s1 = inlined_call_operand.vmem [shape: f32[1,128], index: 1, kind: input, shape index: {}]   ;;  %s530_s2 = inlined_call_operand.vmem [shape: f32[1,128], index: 2, kind: input, shape index: {}]   ;;  %s531_s3 = inlined_call_operand.vmem [shape: bf16[128,128], index: 3, kind: input, shape index: {}]   ;;  %s532_s4 = inlined_call_operand.vmem [shape: f32[1,128], index: 4, kind: input, shape index: {}]   ;;  %s533_s5 = inlined_call_operand.vmem [shape: f32[1,128], index: 5, kind: input, shape index: {}]   ;;  %s534_s6 = inlined_call_operand.vmem [shape: f32[128,128], index: 6, kind: output, shape index: {}]  }
   0x1   :  { %v236_v0 = vld [vmem:[%s528_s0] sm:$0xff]   ;;  %v299_v9 = vld [vmem:[%s528_s0 + $0x8] sm:$0xff]   ;;  %v300_v20 = vld [vmem:[%s528_s0 + $0x10] sm:$0xff]  }
   0x2   :  { %v354_v1 = vld [vmem:[%s529_s1] ss:$0 sm:$0xff]  ;;  %v237_v2 = vunpack.c.l.bf16 %v236_v0  ;;  %v238_v5 = vunpack.c.h.bf16 %v236_v0  ;;  %v306_v10 = vld [vmem:[%s531_s3 + $0x8] sm:$0xff]   ;;  %v241_v14 = vunpack.c.l.bf16 %v299_v9  ;;  %v242_v18 = vunpack.c.h.bf16 %v299_v9  ;;  %v307_v21 = vld [vmem:[%s531_s3 + $0x10] sm:$0xff]  }
   0x3   :  { %v268_v3 = vld [vmem:[%s531_s3] sm:$0xff]   ;;  %v273_v15 = vunpack.c.l.bf16 %v306_v10  ;;  %v274_v19 = vunpack.c.h.bf16 %v306_v10  ;;  %v245_v32 = vunpack.c.l.bf16 %v300_v20  ;;  %v277_v33 = vunpack.c.l.bf16 %v307_v21  ;;  %v301_v42 = vld [vmem:[%s528_s0 + $0x18] sm:$0xff]  }
   0x4   :  { %v362_v4 = vld [vmem:[%s532_s4] ss:$0 sm:$0xff]  ;;  %v269_v7 = vunpack.c.l.bf16 %v268_v3  ;;  %v270_v8 = vunpack.c.h.bf16 %v268_v3  ;;  %v62_v11 = vmul.f32 %v237_v2, %v354_v1  ;;  %v63_v13 = vmul.f32 %v238_v5, %v354_v1  ;;  %v308_v43 = vld [vmem:[%s531_s3 + $0x18] sm:$0xff]  }
   0x5   :  { %v367_v6 = vld [vmem:[%s530_s2] ss:$0 sm:$0xff]  ;;  %v64_v24 = vmul.f32 %v241_v14, %v354_v1  ;;  %v142_v25 = vmul.f32 %v273_v15, %v362_v4  ;;  %v65_v28 = vmul.f32 %v242_v18, %v354_v1  ;;  %v143_v29 = vmul.f32 %v274_v19, %v362_v4  ;;  %v303_v14 = vld [vmem:[%s528_s0 + $0x28] sm:$0xff]  }
   0x6   :  { %v379_v12 = vld [vmem:[%s533_s5] ss:$0 sm:$0xff]  ;;  %v140_v16 = vmul.f32 %v269_v7, %v362_v4  ;;  %v141_v17 = vmul.f32 %v270_v8, %v362_v4  ;;  %v85_v22 = vadd.f32 %v367_v6, %v62_v11  ;;  %v86_v23 = vadd.f32 %v367_v6, %v63_v13  ;;  %v310_v19 = vld [vmem:[%s531_s3 + $0x28] sm:$0xff]  }
   0x7   :  { %v87_v30 = vadd.f32 %v367_v6, %v64_v24  ;;  %v165_v31 = vadd.f32 %v379_v12, %v142_v25  ;;  %v88_v36 = vadd.f32 %v367_v6, %v65_v28  ;;  %v166_v37 = vadd.f32 %v379_v12, %v143_v29  ;;  %v302_v52 = vld [vmem:[%s528_s0 + $0x20] sm:$0xff]  }
   0x8   :  { %v163_v26 = vadd.f32 %v379_v12, %v140_v16  ;;  %v164_v27 = vadd.f32 %v379_v12, %v141_v17  ;;  %v66_v39 = vmul.f32 %v245_v32, %v354_v1  ;;  %v144_v40 = vmul.f32 %v277_v33, %v362_v4  ;;  %v309_v57 = vld [vmem:[%s531_s3 + $0x20] sm:$0xff]   ;;  %v304_v32 = vld [vmem:[%s528_s0 + $0x30] sm:$0xff]  }
   0x9   :  { %v181_v38 = vadd.f32 %v165_v31, %v87_v30  ;;  %v246_v41 = vunpack.c.h.bf16 %v300_v20  ;;  %v182_v46 = vadd.f32 %v166_v37, %v88_v36  ;;  %v278_v47 = vunpack.c.h.bf16 %v307_v21  ;;  %v311_v33 = vld [vmem:[%s531_s3 + $0x30] sm:$0xff]  }
   0xa   :  { %v179_v34 = vadd.f32 %v163_v26, %v85_v22  ;;  %v180_v35 = vadd.f32 %v164_v27, %v86_v23  ;;  %v89_v49 = vadd.f32 %v367_v6, %v66_v39  ;;  %v167_v50 = vadd.f32 %v379_v12, %v144_v40 }
   0xb   :  { %v197_v48 = vmax.f32 %v181_v38, 0.0  ;;  %v67_v51 = vmul.f32 %v246_v41, %v354_v1  ;;  %v198_v53 = vmax.f32 %v182_v46, 0.0  ;;  %v145_v54 = vmul.f32 %v278_v47, %v362_v4  ;;  %v305_v46 = vld [vmem:[%s528_s0 + $0x38] sm:$0xff]  }
   0xc   :  { %v195_v44 = vmax.f32 %v179_v34, 0.0  ;;  %v196_v45 = vmax.f32 %v180_v35, 0.0  ;;  %v249_v55 = vunpack.c.l.bf16 %v301_v42  ;;  %v281_v56 = vunpack.c.l.bf16 %v308_v43 }
   0xd   :  { %213 = vst [vmem:[%s534_s6 + $0x10] sm:$0xff] %v197_v48  ;;  %v183_v58 = vadd.f32 %v167_v50, %v89_v49  ;;  %v90_v59 = vadd.f32 %v367_v6, %v67_v51  ;;  %v250_v60 = vunpack.c.h.bf16 %v301_v42  ;;  %v282_v61 = vunpack.c.h.bf16 %v308_v43  ;;  %214 = vst [vmem:[%s534_s6 + $0x18] sm:$0xff] %v198_v53 }
   0xe   :  { %211 = vst [vmem:[%s534_s6] sm:$0xff] %v195_v44  ;;  %212 = vst [vmem:[%s534_s6 + $0x8] sm:$0xff] %v196_v45  ;;  %v168_v62 = vadd.f32 %v379_v12, %v145_v54  ;;  %v68_v63 = vmul.f32 %v249_v55, %v354_v1  ;;  %v146_v0 = vmul.f32 %v281_v56, %v362_v4  ;;  %v253_v2 = vunpack.c.l.bf16 %v302_v52  ;;  %v312_v55 = vld [vmem:[%s531_s3 + $0x38] sm:$0xff]  }
   0xf   :  { %v199_v3 = vmax.f32 %v183_v58, 0.0  ;;  %v69_v5 = vmul.f32 %v250_v60, %v354_v1  ;;  %v147_v7 = vmul.f32 %v282_v61, %v362_v4  ;;  %v285_v8 = vunpack.c.l.bf16 %v309_v57 }
  0x10   :  { %v184_v9 = vadd.f32 %v168_v62, %v90_v59  ;;  %v91_v10 = vadd.f32 %v367_v6, %v68_v63  ;;  %v169_v11 = vadd.f32 %v379_v12, %v146_v0  ;;  %v70_v13 = vmul.f32 %v253_v2, %v354_v1 }
  0x11   :  { %215 = vst [vmem:[%s534_s6 + $0x20] sm:$0xff] %v199_v3  ;;  %v92_v15 = vadd.f32 %v367_v6, %v69_v5  ;;  %v170_v16 = vadd.f32 %v379_v12, %v147_v7  ;;  %v148_v17 = vmul.f32 %v285_v8, %v362_v4  ;;  %v254_v18 = vunpack.c.h.bf16 %v302_v52 }
  0x12   :  { %v200_v20 = vmax.f32 %v184_v9, 0.0  ;;  %v185_v21 = vadd.f32 %v169_v11, %v91_v10  ;;  %v93_v22 = vadd.f32 %v367_v6, %v70_v13  ;;  %v286_v23 = vunpack.c.h.bf16 %v309_v57 }
  0x13   :  { %v186_v24 = vadd.f32 %v170_v16, %v92_v15  ;;  %v171_v25 = vadd.f32 %v379_v12, %v148_v17  ;;  %v71_v26 = vmul.f32 %v254_v18, %v354_v1  ;;  %v257_v27 = vunpack.c.l.bf16 %v303_v14 }
  0x14   :  { %216 = vst [vmem:[%s534_s6 + $0x28] sm:$0xff] %v200_v20  ;;  %v201_v28 = vmax.f32 %v185_v21, 0.0  ;;  %v149_v29 = vmul.f32 %v286_v23, %v362_v4  ;;  %v289_v30 = vunpack.c.l.bf16 %v310_v19  ;;  %v258_v31 = vunpack.c.h.bf16 %v303_v14 }
  0x15   :  { %v202_v34 = vmax.f32 %v186_v24, 0.0  ;;  %v187_v35 = vadd.f32 %v171_v25, %v93_v22  ;;  %v94_v36 = vadd.f32 %v367_v6, %v71_v26  ;;  %v72_v37 = vmul.f32 %v257_v27, %v354_v1 }
  0x16   :  { %217 = vst [vmem:[%s534_s6 + $0x30] sm:$0xff] %v201_v28  ;;  %v172_v38 = vadd.f32 %v379_v12, %v149_v29  ;;  %v150_v39 = vmul.f32 %v289_v30, %v362_v4  ;;  %v73_v40 = vmul.f32 %v258_v31, %v354_v1  ;;  %v290_v41 = vunpack.c.h.bf16 %v310_v19 }
  0x17   :  { %218 = vst [vmem:[%s534_s6 + $0x38] sm:$0xff] %v202_v34  ;;  %v203_v42 = vmax.f32 %v187_v35, 0.0  ;;  %v95_v43 = vadd.f32 %v367_v6, %v72_v37  ;;  %v261_v44 = vunpack.c.l.bf16 %v304_v32  ;;  %v293_v45 = vunpack.c.l.bf16 %v311_v33 }
  0x18   :  { %v188_v47 = vadd.f32 %v172_v38, %v94_v36  ;;  %v173_v48 = vadd.f32 %v379_v12, %v150_v39  ;;  %v96_v49 = vadd.f32 %v367_v6, %v73_v40  ;;  %v151_v50 = vmul.f32 %v290_v41, %v362_v4 }
  0x19   :  { %219 = vst [vmem:[%s534_s6 + $0x40] sm:$0xff] %v203_v42  ;;  %v74_v51 = vmul.f32 %v261_v44, %v354_v1  ;;  %v152_v52 = vmul.f32 %v293_v45, %v362_v4  ;;  %v262_v53 = vunpack.c.h.bf16 %v304_v32  ;;  %v294_v54 = vunpack.c.h.bf16 %v311_v33 }
  0x1a   :  { %v204_v56 = vmax.f32 %v188_v47, 0.0  ;;  %v189_v57 = vadd.f32 %v173_v48, %v95_v43  ;;  %v174_v58 = vadd.f32 %v379_v12, %v151_v50  ;;  %v265_v59 = vunpack.c.l.bf16 %v305_v46 }
  0x1b   :  { %v97_v60 = vadd.f32 %v367_v6, %v74_v51  ;;  %v175_v61 = vadd.f32 %v379_v12, %v152_v52  ;;  %v75_v62 = vmul.f32 %v262_v53, %v354_v1  ;;  %v153_v63 = vmul.f32 %v294_v54, %v362_v4 }
  0x1c   :  { %220 = vst [vmem:[%s534_s6 + $0x48] sm:$0xff] %v204_v56  ;;  %v205_v0 = vmax.f32 %v189_v57, 0.0  ;;  %v190_v2 = vadd.f32 %v174_v58, %v96_v49  ;;  %v76_v3 = vmul.f32 %v265_v59, %v354_v1  ;;  %v297_v5 = vunpack.c.l.bf16 %v312_v55 }
  0x1d   :  { %v191_v7 = vadd.f32 %v175_v61, %v97_v60  ;;  %v98_v8 = vadd.f32 %v367_v6, %v75_v62  ;;  %v176_v9 = vadd.f32 %v379_v12, %v153_v63  ;;  %v266_v10 = vunpack.c.h.bf16 %v305_v46 }
  0x1e   :  { %221 = vst [vmem:[%s534_s6 + $0x50] sm:$0xff] %v205_v0  ;;  %v206_v11 = vmax.f32 %v190_v2, 0.0  ;;  %v99_v13 = vadd.f32 %v367_v6, %v76_v3  ;;  %v154_v14 = vmul.f32 %v297_v5, %v362_v4  ;;  %v298_v15 = vunpack.c.h.bf16 %v312_v55 }
  0x1f   :  { %v207_v16 = vmax.f32 %v191_v7, 0.0  ;;  %v192_v17 = vadd.f32 %v176_v9, %v98_v8  ;;  %v77_v18 = vmul.f32 %v266_v10, %v354_v1 }
  0x20   :  { %222 = vst [vmem:[%s534_s6 + $0x58] sm:$0xff] %v206_v11  ;;  %v177_v19 = vadd.f32 %v379_v12, %v154_v14  ;;  %v155_v20 = vmul.f32 %v298_v15, %v362_v4 }
  0x21   :  { %223 = vst [vmem:[%s534_s6 + $0x60] sm:$0xff] %v207_v16  ;;  %v208_v21 = vmax.f32 %v192_v17, 0.0  ;;  %v100_v22 = vadd.f32 %v367_v6, %v77_v18 }
  0x22   :  { %v193_v23 = vadd.f32 %v177_v19, %v99_v13  ;;  %v178_v24 = vadd.f32 %v379_v12, %v155_v20 }
  0x23   :  { %224 = vst [vmem:[%s534_s6 + $0x68] sm:$0xff] %v208_v21 }
  0x24   :  { %v209_v1 = vmax.f32 %v193_v23, 0.0  ;;  %v194_v25 = vadd.f32 %v178_v24, %v100_v22 }
  0x26   :  { %225 = vst [vmem:[%s534_s6 + $0x70] sm:$0xff] %v209_v1  ;;  %v210_v4 = vmax.f32 %v194_v25, 0.0 }
  0x28   :  { %226 = vst [vmem:[%s534_s6 + $0x78] sm:$0xff] %v210_v4 }

</bundles_post_ra>
